<compile_context>
chip_gen: v6e
topology: v6e:2x2x1
jax: 0.10.0
libtpu: 0.0.40
codegen_flags: <defaults>
</compile_context>

<pallas_src>
import jax
import jax.numpy as jnp
from jax.experimental import pallas as pl
from jax.experimental.pallas import tpu as pltpu


# ---------------------------------------------------------------------------
# Kernels
# ---------------------------------------------------------------------------

def _dense_readout_fused_kernel(x_ref, w_ref, b_ref, o_ref):
    """Single-shot y = x @ W + bias (whole problem resident in VMEM).

    x_ref: (B, D)   input (any float dtype; cast to the weight dtype in-kernel)
    w_ref: (D, N)   weight, pre-transposed at prep time (compute dtype)
    b_ref: (1, N)   f32 bias row (zeros if the module has bias=False)
    o_ref: (B, N)   f32 output
    """
    w = w_ref[...]
    x = x_ref[...].astype(w.dtype)            # in-kernel cast: no wrapper HLO
    y = jnp.dot(x, w, preferred_element_type=jnp.float32)   # canonical MXU dims
    o_ref[...] = y + b_ref[...]


def _dense_readout_tiled_kernel(x_ref, w_ref, b_ref, o_ref):
    """(N-parallel, K-reduction) tiled fallback for large D.

    Grid = (N blocks ["parallel"], K blocks ["arbitrary"]). The output block is
    resident across the K axis, so we accumulate straight into it (no scratch)
    and fold the bias into the k == 0 initialization.
    """
    k = pl.program_id(1)

    @pl.when(k == 0)
    def _():
        o_ref[...] = jnp.broadcast_to(b_ref[...], o_ref.shape)

    w = w_ref[...]
    x = x_ref[...].astype(w.dtype)
    o_ref[...] += jnp.dot(x, w, preferred_element_type=jnp.float32)


# ---------------------------------------------------------------------------
# Parameter prep (one-time, outside the per-call hot path)
# ---------------------------------------------------------------------------

def prepare_params(weight, bias, *, compute_dtype=jnp.bfloat16,
                   pad_out_to=None, k_align=2048):
    """Prepare DenseReadout parameters once for the kernel.

    weight : (outdims, D) f32, torch Linear layout.
    bias   : (outdims,) f32 or None.
    Returns (w_prep (D[_pad], N[_pad]) compute_dtype, bias_row (1, N[_pad]) f32,
             outdims).

    The weight is transposed to (D, N) ONCE here (contiguous K-slab DMAs,
    canonical MXU contraction) and, if D is large enough to ever be K-tiled,
    its contraction dim is zero-padded ONCE to a multiple of k_align so the
    per-call forward never re-pads the dominant operand in HBM.
    """
    n, d = weight.shape
    bias_row = (jnp.zeros((1, n), jnp.float32) if bias is None
                else bias.reshape(1, n).astype(jnp.float32))
    if pad_out_to is not None and n % pad_out_to != 0:
        n_pad = pl.cdiv(n, pad_out_to) * pad_out_to
        weight = jnp.pad(weight, ((0, n_pad - n), (0, 0)))
        bias_row = jnp.pad(bias_row, ((0, 0), (0, n_pad - n)))
    w_t = jnp.transpose(weight)                      # (D, N_pad) — one-time
    if k_align is not None and d > k_align and d % k_align != 0:
        d_pad = pl.cdiv(d, k_align) * k_align
        w_t = jnp.pad(w_t, ((0, d_pad - d), (0, 0)))  # one-time, prep only
    return w_t.astype(compute_dtype), bias_row, n


# ---------------------------------------------------------------------------
# Forward
# ---------------------------------------------------------------------------

def dense_readout_forward(x_nchw, w_prep, bias_row, n_out=None, *,
                          tk=2048, tn=512, max_fused_bytes=24 * 1024 * 1024):
    """Forward: y = x.view(B, C*W*H) @ W^T + bias, returns (B, outdims) f32.

    w_prep is the (D[_pad], N[_pad]) weight from prepare_params. If n_out is
    None the (possibly padded) output is returned as-is (no slice HLO); with
    the default pad_out_to=None that is exactly (B, outdims).
    """
    b, c, w, h = x_nchw.shape
    d = c * w * h
    d_pad, n_pad = w_prep.shape
    assert d_pad >= d, "weight feature dim must cover C*W*H"

    # Flatten exactly like torch's x.view(b, c*w*h). No per-call dtype cast
    # (done in-kernel). Only the tiny x row block is padded if the weight's
    # contraction dim was K-aligned at prep time (large ragged D only).
    x2d = x_nchw.reshape(b, d)
    if d_pad != d:
        x2d = jnp.pad(x2d, ((0, 0), (0, d_pad - d)))

    operand_bytes = (x2d.size * x2d.dtype.itemsize
                     + w_prep.size * jnp.dtype(w_prep.dtype).itemsize
                     + bias_row.size * 4 + b * n_pad * 4)

    if operand_bytes <= max_fused_bytes:
        # Everything resident in VMEM: single step, no grid, no scratch, no
        # pipeline (so no double-buffering — the raised threshold is safe even
        # on v7x's 64 MiB physical VMEM).
        vmem_limit = max(int(operand_bytes) + (2 << 20), 16 << 20)
        out = pl.pallas_call(
            _dense_readout_fused_kernel,
            out_shape=jax.ShapeDtypeStruct((b, n_pad), jnp.float32),
            in_specs=[
                pl.BlockSpec(memory_space=pltpu.MemorySpace.VMEM),  # x
                pl.BlockSpec(memory_space=pltpu.MemorySpace.VMEM),  # weight
                pl.BlockSpec(memory_space=pltpu.MemorySpace.VMEM),  # bias
            ],
            out_specs=pl.BlockSpec(memory_space=pltpu.MemorySpace.VMEM),
            compiler_params=pltpu.CompilerParams(vmem_limit_bytes=vmem_limit),
        )(x2d, w_prep, bias_row)
    else:
        # Large D: tile the contraction axis (last grid axis, "arbitrary") and
        # the output axis ("parallel" — feeds v7x's second TensorCore when
        # there is more than one N block).
        n_k = pl.cdiv(d_pad, tk)
        if n_k == 1:
            tk_eff = d_pad
        else:
            assert d_pad % tk == 0, (
                "contraction dim must be a multiple of tk; use the same "
                "k_align=tk in prepare_params so the weight is padded once")
            tk_eff = tk
        tn_eff = tn if (n_pad % tn == 0) else n_pad
        n_j = n_pad // tn_eff
        grid = (n_j, n_k)

        out = pl.pallas_call(
            _dense_readout_tiled_kernel,
            out_shape=jax.ShapeDtypeStruct((b, n_pad), jnp.float32),
            grid=grid,
            in_specs=[
                pl.BlockSpec((b, tk_eff), lambda j, k: (0, k)),       # x K-slab
                pl.BlockSpec((tk_eff, tn_eff), lambda j, k: (k, j)),  # weight slab
                pl.BlockSpec((1, tn_eff), lambda j, k: (0, j)),       # bias block
            ],
            out_specs=pl.BlockSpec((b, tn_eff), lambda j, k: (0, j)),  # resident acc
            compiler_params=pltpu.CompilerParams(
                dimension_semantics=("parallel", "arbitrary"),
            ),
        )(x2d, w_prep, bias_row)

    if n_out is None or n_out == n_pad:
        return out
    return out[:, :n_out]


# ---------------------------------------------------------------------------
# Synthetic parameter init matching DenseReadout.__init__ / initialize()
# ---------------------------------------------------------------------------

def init_dense_readout_params(key, in_shape, outdims, bias=True, init_noise=0.001):
    c, w, h = in_shape
    d = c * w * h
    k_w, k_b = jax.random.split(key)
    # features.data.normal_(0, init_noise)
    weight = init_noise * jax.random.normal(k_w, (outdims, d), dtype=jnp.float32)
    # torch bias is allocated uninitialized; fill deterministically instead.
    b = 0.1 * jax.random.normal(k_b, (outdims,), dtype=jnp.float32) if bias else None
    return weight, b


if __name__ == "__main__":
    key = jax.random.PRNGKey(0)
    k_x, k_p = jax.random.split(key)

    # Shapes consistent with the module: in_shape=(C,W,H)=(4,16,16), outdims=32.
    B, C, W, H = 2, 4, 16, 16
    outdims = 32

    x = jax.random.normal(k_x, (B, C, W, H), dtype=jnp.float32)
    weight, bias = init_dense_readout_params(k_p, (C, W, H), outdims, bias=True)

    # One-time prep: bf16 (D, N) weight for the MXU; no N padding at small
    # outdims (the dominant weight read stays 32 rows, store is simply masked).
    w_prep, bias_row, n_out = prepare_params(weight, bias,
                                             compute_dtype=jnp.bfloat16)

    # Fused (single-step) path — the one the shipped shapes hit.
    y = dense_readout_forward(x, w_prep, bias_row)
    y = jax.block_until_ready(y)
    assert y.shape == (B, outdims)

    # Reference with the same bf16-quantized operands (checks the kernel math).
    xq = x.reshape(B, -1).astype(jnp.bfloat16).astype(jnp.float32)
    wq = weight.astype(jnp.bfloat16).astype(jnp.float32)
    y_ref_q = xq @ wq.T + bias[None, :]
    assert jnp.allclose(y, y_ref_q, atol=1e-5, rtol=1e-5)

    # Semantics vs. the pure-f32 torch forward (difference is bf16 operand
    # quantization only; accumulation stays f32).
    y_ref = x.reshape(B, -1) @ weight.T + bias[None, :]
    assert jnp.allclose(y, y_ref, atol=5e-3, rtol=5e-3)

    # Exercise the tiled fallback path (forced) — D <= tk here so it runs as a
    # single (1, 1) grid step over full-dim blocks.
    y_tiled = dense_readout_forward(x, w_prep, bias_row, max_fused_bytes=0)
    y_tiled = jax.block_until_ready(y_tiled)
    assert jnp.allclose(y_tiled, y_ref_q, atol=1e-5, rtol=1e-5)

    # Optional lane-dense output variant (for batched-readout setups): pad N
    # to 128 at prep, slice the real outdims back out.
    w_prep_p, bias_row_p, n_out_p = prepare_params(
        weight, bias, compute_dtype=jnp.bfloat16, pad_out_to=128)
    y_pad = dense_readout_forward(x, w_prep_p, bias_row_p, n_out_p)
    y_pad = jax.block_until_ready(y_pad)
    assert y_pad.shape == (B, outdims)
    assert jnp.allclose(y_pad, y_ref_q, atol=1e-5, rtol=1e-5)

    print("KERNEL_OK")
</pallas_src>

<mosaic_0001>
module attributes {stable_mosaic.version = 11 : i64} {
  func.func @_dense_readout_fused_kernel(%arg0: memref<2x1024xf32, #tpu.memory_space<vmem>>, %arg1: memref<1024x32xbf16, #tpu.memory_space<vmem>>, %arg2: memref<1x32xf32, #tpu.memory_space<vmem>>, %arg3: memref<2x32xf32, #tpu.memory_space<vmem>>) attributes {dimension_semantics = [], scalar_prefetch = 0 : i64, scratch_operands = 0 : i64, tpu.core_type = #tpu.core_type<tc>} {
    %c0 = arith.constant 0 : index
    %c0_0 = arith.constant 0 : index
    %0 = vector.load %arg1[%c0, %c0_0] : memref<1024x32xbf16, #tpu.memory_space<vmem>>, vector<1024x32xbf16>
    %c0_1 = arith.constant 0 : index
    %c0_2 = arith.constant 0 : index
    %1 = vector.load %arg0[%c0_1, %c0_2] : memref<2x1024xf32, #tpu.memory_space<vmem>>, vector<2x1024xf32>
    %2 = arith.truncf %1 : vector<2x1024xf32> to vector<2x1024xbf16>
    %cst = arith.constant dense<0.000000e+00> : vector<2x32xf32>
    %3 = tpu.matmul %2, %0, %cst {dimension_numbers = #tpu.dot_dimension_numbers<[1], [0], [0], [1], [0, 0, 1, 1], [], []>} : vector<2x1024xbf16>, vector<1024x32xbf16>, vector<2x32xf32> -> vector<2x32xf32>
    %c0_3 = arith.constant 0 : index
    %c0_4 = arith.constant 0 : index
    %4 = vector.load %arg2[%c0_3, %c0_4] : memref<1x32xf32, #tpu.memory_space<vmem>>, vector<1x32xf32>
    %5 = vector.broadcast %4 : vector<1x32xf32> to vector<2x32xf32>
    %6 = arith.addf %3, %5 : vector<2x32xf32>
    %c0_5 = arith.constant 0 : index
    %c0_6 = arith.constant 0 : index
    %7 = vector.load %arg3[%c0_5, %c0_6] : memref<2x32xf32, #tpu.memory_space<vmem>>, vector<2x32xf32>
    tpu.vector_store %arg3[%c0_5, %c0_6], %6 {strides = array<i32>} : memref<2x32xf32, #tpu.memory_space<vmem>>, vector<2x32xf32>,
    return
  }
}

</mosaic_0001>

<bundles_post_ra>
// kernel: tpu_custom_call.1
= control target key start
LH: loop header
LB: loop body
LE: loop exit
PB: predicated region body
PF: predicated region fallthrough
CT: control target
= control target key end

     0   :  { %v152_v28 = vlaneseq  ;;  %v1008_v36 = vmov 1983009808   ;;  %s1240_s0 = inlined_call_operand.vmem [shape: f32[2,1024], index: 0, kind: input, shape index: {}]   ;;  %s1241_s1 = inlined_call_operand.vmem [shape: bf16[1024,32], index: 1, kind: input, shape index: {}]   ;;  %s1242_s2 = inlined_call_operand.vmem [shape: f32[1,32], index: 2, kind: input, shape index: {}]   ;;  %s1243_s3 = inlined_call_operand.hbm [shape: f32[2,32], index: 3, kind: output, shape index: {}]  }
   0x1   :  { %v920_v0 = vld [vmem:[%s1241_s1 + $0x78] sm:$0xff]   ;;  %v924_v4 = vld [vmem:[%s1241_s1 + $0x70] sm:$0xff]   ;;  %v928_v8 = vld [vmem:[%s1241_s1 + $0x68] sm:$0xff]   ;;  %v150_v37 = vunpack.c.l.s4 %v1008_v36 }
   0x2   :  { %v921_v1 = vld [vmem:[%s1241_s1 + $0xf8] sm:$0xff]   ;;  %830 = vmatprep.subr.bf16.mxu0 %v920_v0  ;;  %v925_v5 = vld [vmem:[%s1241_s1 + $0xf0] sm:$0xff]   ;;  %v929_v9 = vld [vmem:[%s1241_s1 + $0xe8] sm:$0xff]   ;;  %v153_v33 = vshrl.u32 %v152_v28, 7 }
   0x3   :  { %v922_v2 = vld [vmem:[%s1241_s1 + $0x38] sm:$0xff]   ;;  %852 = vmatprep.subr.bf16.mxu1 %v921_v1  ;;  %v926_v6 = vld [vmem:[%s1241_s1 + $0x30] sm:$0xff]   ;;  %v930_v10 = vld [vmem:[%s1241_s1 + $0x28] sm:$0xff]   ;;  %v151_v39 = vunpack.c.0.s8 %v150_v37 }
   0x4   :  { %v923_v3 = vld [vmem:[%s1241_s1 + $0xb8] sm:$0xff]   ;;  %831 = vmatpush3.bf16.msra.mxu0 %v922_v2  ;;  %v927_v7 = vld [vmem:[%s1241_s1 + $0xb0] sm:$0xff]   ;;  %v931_v11 = vld [vmem:[%s1241_s1 + $0xa8] sm:$0xff]  }
   0x5   :  { %853 = vmatpush3.bf16.msra.mxu1 %v923_v3  ;;  %832 = vmatprep.subr.bf16.mxu0 %v924_v4  ;;  %v932_v12 = vld [vmem:[%s1241_s1 + $0x60] sm:$0xff]   ;;  %v936_v16 = vld [vmem:[%s1241_s1 + $0x58] sm:$0xff]   ;;  %v940_v20 = vld [vmem:[%s1241_s1 + $0x50] sm:$0xff]   ;;  %v1135_v41 = vsub.s32 %v151_v39, %v153_v33 }
   0x6   :  { %854 = vmatprep.subr.bf16.mxu1 %v925_v5  ;;  %v933_v13 = vld [vmem:[%s1241_s1 + $0xe0] sm:$0xff]   ;;  %v937_v17 = vld [vmem:[%s1241_s1 + $0xd8] sm:$0xff]   ;;  %v941_v21 = vld [vmem:[%s1241_s1 + $0xd0] sm:$0xff]  }
   0x7   :  { %v934_v14 = vld [vmem:[%s1241_s1 + $0x20] sm:$0xff]   ;;  %v938_v18 = vld [vmem:[%s1241_s1 + $0x18] sm:$0xff]   ;;  %v942_v22 = vld [vmem:[%s1241_s1 + $0x10] sm:$0xff]  }
   0x8   :  { %833 = vmatpush3.bf16.msra.mxu0 %v926_v6  ;;  %v935_v15 = vld [vmem:[%s1241_s1 + $0xa0] sm:$0xff]   ;;  %v939_v19 = vld [vmem:[%s1241_s1 + $0x98] sm:$0xff]   ;;  %v943_v23 = vld [vmem:[%s1241_s1 + $0x90] sm:$0xff]  }
   0x9   :  { %855 = vmatpush3.bf16.msra.mxu1 %v927_v7  ;;  %834 = vmatprep.subr.bf16.mxu0 %v928_v8  ;;  %v944_v24 = vld [vmem:[%s1241_s1 + $0x48] sm:$0xff]   ;;  %v948_v29 = vld [vmem:[%s1241_s1 + $0x40] sm:$0xff]   ;;  %v953_v35 = vld [vmem:[%s1241_s1 + $0x178] sm:$0xff]  }
   0xa   :  { %856 = vmatprep.subr.bf16.mxu1 %v929_v9  ;;  %v945_v25 = vld [vmem:[%s1241_s1 + $0xc8] sm:$0xff]   ;;  %v949_v30 = vld [vmem:[%s1241_s1 + $0xc0] sm:$0xff]   ;;  %v954_v38 = vld [vmem:[%s1241_s1 + $0x1f8] sm:$0xff]  }
   0xb   :  { %v946_v26 = vld [vmem:[%s1241_s1 + $0x8] sm:$0xff]   ;;  %v950_v31 = vld [vmem:[%s1241_s1] sm:$0xff]   ;;  %v955_v46 = vld [vmem:[%s1241_s1 + $0x138] sm:$0xff]  }
   0xc   :  { %835 = vmatpush3.bf16.msra.mxu0 %v930_v10  ;;  %v947_v27 = vld [vmem:[%s1241_s1 + $0x88] sm:$0xff]   ;;  %v951_v32 = vld [vmem:[%s1241_s1 + $0x80] sm:$0xff]   ;;  %v956_v49 = vld [vmem:[%s1241_s1 + $0x1b8] sm:$0xff]  }
   0xd   :  { %857 = vmatpush3.bf16.msra.mxu1 %v931_v11  ;;  %836 = vmatprep.subr.bf16.mxu0 %v932_v12  ;;  %v144_v34 = vld [vmem:[%s1240_s0] sm:$0xff]  ;;  %v957_v52 = vld [vmem:[%s1241_s1 + $0x170] sm:$0xff]   ;;  %v961_v56 = vld [vmem:[%s1241_s1 + $0x168] sm:$0xff]  }
   0xe   :  { %858 = vmatprep.subr.bf16.mxu1 %v933_v13  ;;  %v148_v40 = vcombine.high %v144_v34, %v144_v34  ;;  %v155_v42 = vrot.slane %v144_v34, %v1135_v41  ;;  %v958_v53 = vld [vmem:[%s1241_s1 + $0x1f0] sm:$0xff]   ;;  %v962_v57 = vld [vmem:[%s1241_s1 + $0x1e8] sm:$0xff]   ;;  %v965_v60 = vld [vmem:[%s1241_s1 + $0x160] sm:$0xff]  }
   0xf   :  { %v959_v54 = vld [vmem:[%s1241_s1 + $0x130] sm:$0xff]   ;;  %v963_v58 = vld [vmem:[%s1241_s1 + $0x128] sm:$0xff]   ;;  %v966_v61 = vld [vmem:[%s1241_s1 + $0x1e0] sm:$0xff]  }
  0x10   :  { %837 = vmatpush3.bf16.msra.mxu0 %v934_v14  ;;  %v162_v43 = vrot.slane %v148_v40, %v1135_v41  ;;  %v163_v44 = vcombine.high %v155_v42, %v155_v42  ;;  %v190_v47 = vpack.c.bf16 %v155_v42, %v155_v42  ;;  %v960_v55 = vld [vmem:[%s1241_s1 + $0x1b0] sm:$0xff]   ;;  %v964_v59 = vld [vmem:[%s1241_s1 + $0x1a8] sm:$0xff]   ;;  %v967_v62 = vld [vmem:[%s1241_s1 + $0x120] sm:$0xff]  }
  0x11   :  { %859 = vmatpush3.bf16.msra.mxu1 %v935_v15  ;;  %838 = vmatprep.subr.bf16.mxu0 %v936_v16  ;;  %v968_v63 = vld [vmem:[%s1241_s1 + $0x1a0] sm:$0xff]   ;;  %v969_v0 = vld [vmem:[%s1241_s1 + $0x158] sm:$0xff]   ;;  %v973_v4 = vld [vmem:[%s1241_s1 + $0x150] sm:$0xff]  }
  0x12   :  { %860 = vmatprep.subr.bf16.mxu1 %v937_v17  ;;  %v164_v45 = vcombine.high %v162_v43, %v162_v43  ;;  %v192_v48 = vpack.c.bf16 %v162_v43, %v162_v43  ;;  %v191_v50 = vpack.c.bf16 %v163_v44, %v163_v44  ;;  %v970_v1 = vld [vmem:[%s1241_s1 + $0x1d8] sm:$0xff]   ;;  %v974_v5 = vld [vmem:[%s1241_s1 + $0x1d0] sm:$0xff]   ;;  %v977_v8 = vld [vmem:[%s1241_s1 + $0x148] sm:$0xff]  }
  0x13   :  { %v971_v2 = vld [vmem:[%s1241_s1 + $0x118] sm:$0xff]   ;;  %v975_v6 = vld [vmem:[%s1241_s1 + $0x110] sm:$0xff]   ;;  %v978_v9 = vld [vmem:[%s1241_s1 + $0x1c8] sm:$0xff]  }
  0x14   :  { %839 = vmatpush3.bf16.msra.mxu0 %v938_v18  ;;  %v193_v51 = vpack.c.bf16 %v164_v45, %v164_v45  ;;  %621 = vmatprep.mubr.bf16.mxu0 %v191_v50  ;;  %v972_v3 = vld [vmem:[%s1241_s1 + $0x198] sm:$0xff]   ;;  %v976_v7 = vld [vmem:[%s1241_s1 + $0x190] sm:$0xff]   ;;  %v145_v10 = vld [vmem:[%s1240_s0 + $0x8] sm:$0xff] }
  0x15   :  { %861 = vmatpush3.bf16.msra.mxu1 %v939_v19  ;;  %840 = vmatprep.subr.bf16.mxu0 %v940_v20 }
  0x16   :  { %862 = vmatprep.subr.bf16.mxu1 %v941_v21  ;;  %661 = vmatprep.mubr.bf16.mxu1 %v193_v51 }
  0x18   :  { %841 = vmatpush3.bf16.msra.mxu0 %v942_v22 }
  0x19   :  { %863 = vmatpush3.bf16.msra.mxu1 %v943_v23  ;;  %842 = vmatprep.subr.bf16.mxu0 %v944_v24 }
  0x1a   :  { %864 = vmatprep.subr.bf16.mxu1 %v945_v25 }
  0x1c   :  { %843 = vmatpush3.bf16.msra.mxu0 %v946_v26 }
  0x1d   :  { %865 = vmatpush3.bf16.msra.mxu1 %v947_v27  ;;  %844 = vmatprep.subr.bf16.mxu0 %v948_v29 }
  0x1e   :  { %866 = vmatprep.subr.bf16.mxu1 %v949_v30 }
  0x20   :  { %845 = vmatpush3.bf16.msra.mxu0 %v950_v31 }
  0x21   :  { %867 = vmatpush3.bf16.msra.mxu1 %v951_v32  ;;  %874 = vmatprep.subr.bf16.mxu0 %v953_v35 }
  0x22   :  { %896 = vmatprep.subr.bf16.mxu1 %v954_v38 }
  0x23   :  { %622 = vmatmul.mubr.bf16.vlgmr.msra.gmra.mxu0 %v190_v47 }
  0x24   :  { %662 = vmatmul.mubr.bf16.vlgmr.msra.gmra.mxu1 %v192_v48  ;;  %875 = vmatpush3.bf16.msra.mxu0 %v955_v46 }
  0x25   :  { %897 = vmatpush3.bf16.msra.mxu1 %v956_v49  ;;  %876 = vmatprep.subr.bf16.mxu0 %v957_v52 }
  0x26   :  { %898 = vmatprep.subr.bf16.mxu1 %v958_v53 }
  0x28   :  { %877 = vmatpush3.bf16.msra.mxu0 %v959_v54 }
  0x29   :  { %899 = vmatpush3.bf16.msra.mxu1 %v960_v55  ;;  %878 = vmatprep.subr.bf16.mxu0 %v961_v56 }
  0x2a   :  { %900 = vmatprep.subr.bf16.mxu1 %v962_v57 }
  0x2c   :  { %879 = vmatpush3.bf16.msra.mxu0 %v963_v58 }
  0x2d   :  { %901 = vmatpush3.bf16.msra.mxu1 %v964_v59  ;;  %880 = vmatprep.subr.bf16.mxu0 %v965_v60 }
  0x2e   :  { %902 = vmatprep.subr.bf16.mxu1 %v966_v61 }
  0x30   :  { %881 = vmatpush3.bf16.msra.mxu0 %v967_v62 }
  0x31   :  { %903 = vmatpush3.bf16.msra.mxu1 %v968_v63  ;;  %882 = vmatprep.subr.bf16.mxu0 %v969_v0 }
  0x32   :  { %904 = vmatprep.subr.bf16.mxu1 %v970_v1 }
  0x34   :  { %883 = vmatpush3.bf16.msra.mxu0 %v971_v2 }
  0x35   :  { %905 = vmatpush3.bf16.msra.mxu1 %v972_v3  ;;  %884 = vmatprep.subr.bf16.mxu0 %v973_v4 }
  0x36   :  { %906 = vmatprep.subr.bf16.mxu1 %v974_v5 }
  0x37   :  { %8 = vsyncpa [#allocation3], 0  ;;  %v172_v11 = vrot.slane %v145_v10, %v1135_v41  ;;  %v165_v12 = vcombine.high %v145_v10, %v145_v10  ;;  %v979_v13 = vld [vmem:[%s1241_s1 + $0x108] sm:$0xff]   ;;  %v981_v17 = vld [vmem:[%s1241_s1 + $0x140] sm:$0xff]   ;;  %s1009_s9 = smov [#allocation2]   ;;  %vm749_vm0 = vcmask 254976  }
  0x38   :  { %885 = vmatpush3.bf16.msra.mxu0 %v975_v6  ;;  %v980_v14 = vld [vmem:[%s1241_s1 + $0x188] sm:$0xff]   ;;  %v982_v18 = vld [vmem:[%s1241_s1 + $0x1c0] sm:$0xff]   ;;  %s757_s10 = sshll.u32 %s1009_s9, 4  ;;  %s758_s10 = int_to_ptr.vmem [resolvable:$true] %s757_s10 }
  0x39   :  { %907 = vmatpush3.bf16.msra.mxu1 %v976_v7  ;;  %v180_v15 = vcombine.high %v172_v11, %v172_v11  ;;  %v179_v16 = vrot.slane %v165_v12, %v1135_v41  ;;  %886 = vmatprep.subr.bf16.mxu0 %v977_v8  ;;  %v983_v21 = vld [vmem:[%s1241_s1 + $0x100] sm:$0xff]   ;;  %v194_v24 = vpack.c.bf16 %v172_v11, %v172_v11  ;;  %p991_p1 = scmp.lt.s32.totalorder %s758_s10, %s758_s10 }
  0x3a   :  { %908 = vmatprep.subr.bf16.mxu1 %v978_v9  ;;  %v984_v22 = vld [vmem:[%s1241_s1 + $0x180] sm:$0xff]  }
  0x3b   :  { %v195_v19 = vpack.c.bf16 %v180_v15, %v180_v15  ;;  %v181_v20 = vcombine.high %v179_v16, %v179_v16  ;;  %v196_v25 = vpack.c.bf16 %v179_v16, %v179_v16  ;;  %v765_v35 = vld [vmem:[%s1242_s2] ss:$0 sm:$0xff]  ;;  %s986_s2 = scalar_lea.vmem %s758_s10, 32 }
  0x3c   :  { %887 = vmatpush3.bf16.msra.mxu0 %v979_v13  ;;  %p987_p0 = scmp.ne.s32.totalorder %s758_s10, %s986_s2  ;;  %p992_p2 = scmp.lt.s32.totalorder %s986_s2, %s986_s2 }
  0x3d   :  { %909 = vmatpush3.bf16.msra.mxu1 %v980_v14  ;;  %v197_v23 = vpack.c.bf16 %v181_v20, %v181_v20  ;;  %888 = vmatprep.subr.bf16.mxu0 %v981_v17 }
  0x3e   :  { %910 = vmatprep.subr.bf16.mxu1 %v982_v18  ;;  %701 = vmatprep.mubr.bf16.mxu0 %v195_v19  ;;  %p993_p3 = por %p992_p2, %p991_p1 }
  0x3f   :  { %741 = vmatprep.mubr.bf16.mxu1 %v197_v23 }
  0x40   :  { %889 = vmatpush3.bf16.msra.mxu0 %v983_v21  ;;  %p994_p4 = pnand %p993_p3, %p987_p0 }
  0x41   :  { %911 = vmatpush3.bf16.msra.mxu1 %v984_v22 }
  0x43   :  { %702 = vmatmul.mubr.bf16.vlgmr.msra.gmra.mxu0 %v194_v24 }
  0x44   :  { %742 = vmatmul.mubr.bf16.vlgmr.msra.gmra.mxu1 %v196_v25 }
  0xe3   :  { %v846_v26 = vpop.f32.mrf.mxu0 }
  0xe4   :  { %v868_v27 = vpop.f32.mrf.mxu1 }
  0xe5   :  { %v847_v28 = vpop.f32.mrf.mxu0 }
  0xe6   :  { %v869_v29 = vpop.f32.mrf.mxu1  ;;  %v848_v34 = vadd.f32 %v847_v28, %v846_v26 }
  0xe7   :  { %v849_v30 = vpop.f32.mrf.mxu0  ;;  %v870_v37 = vadd.f32 %v869_v29, %v868_v27 }
  0xe8   :  { %v871_v31 = vpop.f32.mrf.mxu1  ;;  %v624_v36 = vadd.f32 %v848_v34, %v765_v35 }
  0xe9   :  { %v850_v32 = vpop.f32.mrf.mxu0 }
  0xea   :  { %v872_v33 = vpop.f32.mrf.mxu1  ;;  %v664_v42 = vadd.f32 %v870_v37, %v624_v36 }
 0x103   :  { %v890_v38 = vpop.f32.mrf.mxu0 }
 0x104   :  { %v912_v39 = vpop.f32.mrf.mxu1 }
 0x105   :  { %v891_v40 = vpop.f32.mrf.mxu0 }
 0x106   :  { %v913_v41 = vpop.f32.mrf.mxu1  ;;  %v892_v43 = vadd.f32 %v891_v40, %v890_v38 }
 0x107   :  { %v893_v44 = vpop.f32.mrf.mxu0  ;;  %v914_v47 = vadd.f32 %v913_v41, %v912_v39 }
 0x108   :  { %v915_v45 = vpop.f32.mrf.mxu1  ;;  %v704_v46 = vadd.f32 %v892_v43, %v664_v42 }
 0x109   :  { %v894_v48 = vpop.f32.mrf.mxu0 }
 0x10a   :  { %v916_v49 = vpop.f32.mrf.mxu1  ;;  %v744_v50 = vadd.f32 %v914_v47, %v704_v46 }
 0x10c   :  { %750 = vst.msk [vmem:[#allocation2] sm:$0x3] %vm749_vm0, %v744_v50 }
 0x10d   :  { %997 = shalt.err (!%p994_p4)
}
 0x10e   :  { %760 = dma.vmem_to_hbm [thread:$0]  %s758_s10, 32, %s1243_s3, [#allocation3]  }
 0x10f   :  { %1006 = dma.done.wait [#allocation3], 32  }
 0x110   :  { %1007 = vsyncadd [#allocation3], 4294967264 }
 0x111   :  { %764 = vsyncpa [#allocation3], 1 }

</bundles_post_ra>
